<compile_context>
chip_gen: v7x
topology: tpu7x:2x2x1
jax: 0.10.0
libtpu: 0.0.40
codegen_flags: <defaults>
</compile_context>

<pallas_src>
import jax
import jax.numpy as jnp
from jax.experimental import pallas as pl
from jax.experimental.pallas import tpu as pltpu


def mean_pool_kernel(h_ref, m_ref, inv_ref, o_ref, acc_ref):
    # h_ref:   (TB, TS, TH)  hidden states, native dtype (f32 / bf16 / ...)
    # m_ref:   (TB, TS)      float32 attention mask chunk (0/1)
    # inv_ref: (TB, 1)       float32 precomputed 1 / clamp(sum_mask, 1e-9)
    # o_ref:   (TB, TH)      float32 pooled output
    # acc_ref: (TB, TH)      float32 running masked sum (VMEM scratch)
    k = pl.program_id(2)

    @pl.when(k == 0)
    def _init():
        acc_ref[...] = jnp.zeros_like(acc_ref)

    h = h_ref[...]                                   # native dtype, no full-tile upcast
    m = m_ref[...].astype(h.dtype)                   # tiny (TB, TS) cast; 0/1 exact in bf16
    masked = h * m[:, :, None]                       # last_hidden_state * mask (native dtype)
    acc_ref[...] += jnp.sum(masked, axis=1, dtype=jnp.float32)   # f32 accumulation

    @pl.when(k == pl.num_programs(2) - 1)
    def _finalize():
        # sum_embeddings / clamp(sum_mask, 1e-9), division hoisted to wrapper.
        o_ref[...] = acc_ref[...] * inv_ref[...]


def _vmem_budget():
    """Returns (tile working-set budget, vmem_limit_bytes) keyed off chip VMEM."""
    try:
        cap = int(pltpu.get_tpu_info().vmem_capacity_bytes)
    except Exception:
        cap = 64 * 1024 * 1024          # v7x-safe fallback (smallest VMEM generation)
    return cap // 2, (cap // 4) * 3      # e.g. 64/96 MiB on v5e/v6e, 32/48 MiB on v7x


def _choose_tiles(b_pad, s, h, itemsize, budget):
    """Pick (TB, TS, TH): lane-dense TH first, then TS, bounded by the VMEM budget."""
    def cands(n, cap):
        c = [t for t in range(128, min(n, cap) + 1, 128) if n % t == 0]
        return c if c else [n]          # full extent is always a legal block

    th_cands = cands(h, 4096)           # ascending, multiples of 128 (or full H)
    ts_cands = cands(s, 2048)           # ascending, multiples of 128 (or full S)
    tb = 8 if b_pad % 8 == 0 else b_pad

    def cost(tb_, ts_, th_):
        h_tile = tb_ * ts_ * th_ * itemsize
        return (2 * h_tile                              # double-buffered hidden input
                + 2 * tb_ * ts_ * 4                     # double-buffered f32 mask
                + 2 * tb_ * th_ * 4 + tb_ * th_ * 4     # output (x2) + f32 accumulator
                + tb_ * ts_ * th_ * (itemsize + 4))     # in-kernel intermediates headroom

    th = th_cands[0]
    ts = ts_cands[0]
    for cand in th_cands:               # lane width is the biggest lever: grow it first
        if cost(tb, ts, cand) <= budget:
            th = cand
    for cand in ts_cands:               # then grow the sequence tile
        if cost(tb, cand, th) <= budget:
            ts = cand
    for cand in (16, 32):               # H small & budget left -> grow batch tile
        if (b_pad % cand == 0 and cost(cand, ts, th) <= budget
                and (b_pad // cand) * (h // th) >= 2):
            tb = cand
    # Keep >= 2 parallel (batch x hidden) grid steps when possible so v7x's second
    # TensorCore gets work and the software pipeline has something to overlap.
    while (b_pad // tb) * (h // th) < 2 and th % 256 == 0:
        th //= 2
    return tb, ts, th


def mean_pooling(last_hidden_state, attention_mask):
    """last_hidden_state: (B, S, H) float; attention_mask: (B, S) int/bool.

    Returns (B, H) float32, matching PyTorch MeanPooling.forward."""
    B, S, H = last_hidden_state.shape
    itemsize = jnp.dtype(last_hidden_state.dtype).itemsize

    mask_f = attention_mask.astype(jnp.float32)                  # (B, S), lane-dense
    count = jnp.sum(mask_f, axis=1, keepdims=True)               # (B, 1) sum_mask
    inv_count = 1.0 / jnp.maximum(count, 1e-9)                   # clamp(min=1e-9), hoisted

    # Pad batch to a multiple of 8: full-sublane stores + parallel batch steps.
    B_pad = ((B + 7) // 8) * 8
    if B_pad != B:
        pad = B_pad - B
        last_hidden_state = jnp.pad(last_hidden_state, ((0, pad), (0, 0), (0, 0)))
        mask_f = jnp.pad(mask_f, ((0, pad), (0, 0)))
        inv_count = jnp.pad(inv_count, ((0, pad), (0, 0)))

    budget, vmem_limit = _vmem_budget()
    TB, TS, TH = _choose_tiles(B_pad, S, H, itemsize, budget)
    grid = (B_pad // TB, H // TH, S // TS)

    out = pl.pallas_call(
        mean_pool_kernel,
        out_shape=jax.ShapeDtypeStruct((B_pad, H), jnp.float32),
        grid_spec=pltpu.PrefetchScalarGridSpec(
            num_scalar_prefetch=0,
            grid=grid,
            in_specs=[
                # Native-dtype hidden states (no wrapper-side cast).
                pl.BlockSpec((TB, TS, TH), lambda b, hx, k: (b, k, hx)),
                pl.BlockSpec((TB, TS), lambda b, hx, k: (b, k)),
                pl.BlockSpec((TB, 1), lambda b, hx, k: (b, 0)),
            ],
            out_specs=pl.BlockSpec((TB, TH), lambda b, hx, k: (b, hx)),
            scratch_shapes=[pltpu.VMEM((TB, TH), jnp.float32)],
        ),
        compiler_params=pltpu.CompilerParams(
            # Batch and hidden axes are independent (megacore-shardable);
            # the sequence axis is the reduction, placed last and "arbitrary".
            dimension_semantics=("parallel", "parallel", "arbitrary"),
            vmem_limit_bytes=vmem_limit,
        ),
    )(last_hidden_state, mask_f, inv_count)

    return out[:B] if B_pad != B else out


if __name__ == "__main__":
    B, S, H = 2, 8, 32
    key = jax.random.PRNGKey(0)
    k_h, _ = jax.random.split(key)

    last_hidden_state = jax.random.normal(k_h, (B, S, H), dtype=jnp.float32)
    # Deterministic mask: row 0 attends to first 5 tokens, row 1 to first 3.
    lengths = jnp.array([5, 3], dtype=jnp.int32)
    attention_mask = (
        jnp.arange(S, dtype=jnp.int32)[None, :] < lengths[:, None]
    ).astype(jnp.int32)

    pooled = jax.block_until_ready(mean_pooling(last_hidden_state, attention_mask))

    # Pure-JAX reference (mirrors the PyTorch forward exactly).
    mask_ref = attention_mask[..., None].astype(jnp.float32)
    ref = (last_hidden_state * mask_ref).sum(axis=1) / jnp.maximum(
        mask_ref.sum(axis=1), 1e-9
    )
    assert pooled.shape == (B, H)
    assert jnp.allclose(pooled, ref, atol=1e-5, rtol=1e-5)

    # bf16 hidden states flow through the kernel natively (half the HBM traffic);
    # the masked multiply stays bf16, accumulation is f32 inside the kernel.
    hs_bf16 = last_hidden_state.astype(jnp.bfloat16)
    pooled_bf16 = jax.block_until_ready(mean_pooling(hs_bf16, attention_mask))
    ref_bf16 = (hs_bf16.astype(jnp.float32) * mask_ref).sum(axis=1) / jnp.maximum(
        mask_ref.sum(axis=1), 1e-9
    )
    assert jnp.allclose(pooled_bf16, ref_bf16, atol=1e-5, rtol=1e-5)

    print("KERNEL_OK")
</pallas_src>

<mosaic_0001>
module attributes {stable_mosaic.version = 11 : i64} {
  func.func @mean_pool_kernel(%arg0: i32, %arg1: i32, %arg2: i32, %arg3: memref<8x8x32xf32, #tpu.memory_space<vmem>>, %arg4: memref<8x8xf32, #tpu.memory_space<vmem>>, %arg5: memref<8x1xf32, #tpu.memory_space<vmem>>, %arg6: memref<8x32xf32, #tpu.memory_space<vmem>>, %arg7: memref<8x32xf32, #tpu.memory_space<vmem>>) attributes {dimension_semantics = [#tpu.dimension_semantics<parallel>, #tpu.dimension_semantics<parallel>, #tpu.dimension_semantics<arbitrary>], iteration_bounds = array<i64: 1, 1, 1>, scalar_prefetch = 0 : i64, scratch_operands = 1 : i64, tpu.core_type = #tpu.core_type<tc>, window_params = [{transform_indices = @transform_0, window_bounds = array<i64: 8, 8, 32>}, {transform_indices = @transform_1, window_bounds = array<i64: 8, 8>}, {transform_indices = @transform_2, window_bounds = array<i64: 8, 1>}, {transform_indices = @transform_3, window_bounds = array<i64: 8, 32>}]} {
    %c0_i32 = arith.constant 0 : i32
    %0 = arith.cmpi eq, %arg2, %c0_i32 : i32
    %1 = arith.extui %0 : i1 to i32
    %c0_i32_0 = arith.constant 0 : i32
    %2 = arith.cmpi ne, %1, %c0_i32_0 : i32
    scf.if %2 {
      %cst_11 = arith.constant 0.000000e+00 : f32
      %15 = vector.broadcast %cst_11 : f32 to vector<8x32xf32>
      %c0_12 = arith.constant 0 : index
      %c0_13 = arith.constant 0 : index
      %16 = vector.load %arg7[%c0_12, %c0_13] : memref<8x32xf32, #tpu.memory_space<vmem>>, vector<8x32xf32>
      tpu.vector_store %arg7[%c0_12, %c0_13], %15 {strides = array<i32>} : memref<8x32xf32, #tpu.memory_space<vmem>>, vector<8x32xf32>,
    } else {
    }
    %c0 = arith.constant 0 : index
    %c0_1 = arith.constant 0 : index
    %c0_2 = arith.constant 0 : index
    %3 = vector.load %arg3[%c0, %c0_1, %c0_2] : memref<8x8x32xf32, #tpu.memory_space<vmem>>, vector<8x8x32xf32>
    %c0_3 = arith.constant 0 : index
    %c0_4 = arith.constant 0 : index
    %4 = vector.load %arg4[%c0_3, %c0_4] : memref<8x8xf32, #tpu.memory_space<vmem>>, vector<8x8xf32>
    %5 = vector.shape_cast %4 : vector<8x8xf32> to vector<8x8x1xf32>
    %6 = vector.broadcast %5 : vector<8x8x1xf32> to vector<8x8x32xf32>
    %7 = arith.mulf %3, %6 : vector<8x8x32xf32>
    %c0_5 = arith.constant 0 : index
    %c0_6 = arith.constant 0 : index
    %8 = vector.load %arg7[%c0_5, %c0_6] : memref<8x32xf32, #tpu.memory_space<vmem>>, vector<8x32xf32>
    %cst = arith.constant dense<0.000000e+00> : vector<8x32xf32>
    %9 = vector.multi_reduction <add>, %7, %cst [1] : vector<8x8x32xf32> to vector<8x32xf32>
    %10 = arith.addf %8, %9 : vector<8x32xf32>
    %c0_7 = arith.constant 0 : index
    %c0_8 = arith.constant 0 : index
    %11 = vector.load %arg7[%c0_7, %c0_8] : memref<8x32xf32, #tpu.memory_space<vmem>>, vector<8x32xf32>
    tpu.vector_store %arg7[%c0_7, %c0_8], %10 {strides = array<i32>} : memref<8x32xf32, #tpu.memory_space<vmem>>, vector<8x32xf32>,
    %c0_i32_9 = arith.constant 0 : i32
    %12 = arith.cmpi eq, %arg2, %c0_i32_9 : i32
    %13 = arith.extui %12 : i1 to i32
    %c0_i32_10 = arith.constant 0 : i32
    %14 = arith.cmpi ne, %13, %c0_i32_10 : i32
    scf.if %14 {
      %c0_11 = arith.constant 0 : index
      %c0_12 = arith.constant 0 : index
      %15 = vector.load %arg7[%c0_11, %c0_12] : memref<8x32xf32, #tpu.memory_space<vmem>>, vector<8x32xf32>
      %c0_13 = arith.constant 0 : index
      %c0_14 = arith.constant 0 : index
      %16 = vector.load %arg5[%c0_13, %c0_14] : memref<8x1xf32, #tpu.memory_space<vmem>>, vector<8x1xf32>
      %17 = vector.broadcast %16 : vector<8x1xf32> to vector<8x32xf32>
      %18 = arith.mulf %15, %17 : vector<8x32xf32>
      %c0_15 = arith.constant 0 : index
      %c0_16 = arith.constant 0 : index
      %19 = vector.load %arg6[%c0_15, %c0_16] : memref<8x32xf32, #tpu.memory_space<vmem>>, vector<8x32xf32>
      tpu.vector_store %arg6[%c0_15, %c0_16], %18 {strides = array<i32>} : memref<8x32xf32, #tpu.memory_space<vmem>>, vector<8x32xf32>,
    } else {
    }
    return
  }
  func.func @transform_0(%arg0: i32, %arg1: i32, %arg2: i32) -> (i32, i32, i32) {
    %c0_i32 = arith.constant 0 : i32
    return %arg0, %arg2, %arg1 : i32, i32, i32
  }
  func.func @transform_1(%arg0: i32, %arg1: i32, %arg2: i32) -> (i32, i32) {
    %c0_i32 = arith.constant 0 : i32
    return %arg0, %arg2 : i32, i32
  }
  func.func @transform_2(%arg0: i32, %arg1: i32, %arg2: i32) -> (i32, i32) {
    %c0_i32 = arith.constant 0 : i32
    %c0_i32_0 = arith.constant 0 : i32
    return %arg0, %c0_i32 : i32, i32
  }
  func.func @transform_3(%arg0: i32, %arg1: i32, %arg2: i32) -> (i32, i32) {
    %c0_i32 = arith.constant 0 : i32
    return %arg0, %arg1 : i32, i32
  }
}

</mosaic_0001>

<bundles_post_ra>
// kernel: tpu_custom_call.1
= control target key start
LH: loop header
LB: loop body
LE: loop exit
PB: predicated region body
PF: predicated region fallthrough
CT: control target
= control target key end

     0   :  { %8 = vsyncpa [#allocation4], 0  ;;  %s340_s0 = inlined_call_operand.hbm [shape: f32[8,8,32], index: 0, kind: input, shape index: {}]   ;;  %s341_s1 = inlined_call_operand.vmem [shape: f32[8,8], index: 1, kind: input, shape index: {}]   ;;  %s342_s2 = inlined_call_operand.vmem [shape: f32[8,1], index: 2, kind: input, shape index: {}]   ;;  %s343_s3 = inlined_call_operand.hbm [shape: f32[8,32], index: 3, kind: output, shape index: {}]  }
   0x1   :  { %9 = vsyncpa [#allocation5], 0  ;;  %s273_s12 = smov [#allocation3]   ;;  %s225_s16 = scalar_lea.hbm %s340_s0, 1024 }
   0x2   :  { %s15_s13 = sshll.u32 %s273_s12, 4  ;;  %p226_p0 = scmp.ne.s32.totalorder %s340_s0, %s225_s16  ;;  %s16_s13 = int_to_ptr.vmem [resolvable:$true] %s15_s13 }
   0x3   :  { %p229_p1 = scmp.lt.u32.totalorder %s225_s16, %s340_s0 }
   0x5   :  { %p231_p2 = pnand %p229_p1, %p226_p0 }
   0x7   :  { %234 = shalt.err (!%p231_p2)
}
   0x8   :  { %s235_s21 = scalar_lea.vmem %s16_s13, 1024  ;;  %p240_p4 = scmp.lt.s32.totalorder %s16_s13, %s16_s13 }
   0x9   :  { %p236_p3 = scmp.ne.s32.totalorder %s16_s13, %s235_s21  ;;  %p241_p5 = scmp.lt.s32.totalorder %s235_s21, %s235_s21 }
   0xb   :  { %p242_p6 = por %p241_p5, %p240_p4 }
   0xd   :  { %p243_p7 = pnand %p242_p6, %p236_p3 }
   0xf   :  { %246 = shalt.err (!%p243_p7)
}
  0x10   :  { %s274_s22 = smov 128   ;;  %s275_s23 = smov 8  }
  0x11   :  { %21 = dma.hbm_to_vmem [thread:$0]  %s340_s0, 1024, %s16_s13, [#allocation4], %s274_s22, %s274_s22, %s275_s23  }
  0x12   :  { %269 = dma.done.wait [#allocation4], 1024  }
  0x13   :  { %270 = vsyncadd [#allocation4], 4294966272  ;;  %v44_v0 = vlaneseq  ;;  %v276_v1 = vmov 0   ;;  %v43_v7 = vld [vmem:[%s341_s1] sm:$0xff]  ;;  %vm33_vm0 = vcmask 261120   ;;  %v277_v20 = vmov 0.0  }
  0x14   :  { %224 = vset.pattern.permute.xlu0 %v276_v1  ;;  %34 = vst.msk [vmem:[#allocation2] sm:$0xff] %vm33_vm0, %v277_v20  ;;  %v195_v21 = vld [vmem:[%s342_s2] sm:$0xff]  ;;  %v37_v22 = vld [vmem:[#allocation3 + $0x10] sm:$0xff]  ;;  %v35_v23 = vld [vmem:[#allocation3] sm:$0xff]  ;;  %vm174_vm1 = vcmask 1041409   ;;  %vm176_vm2 = vcmask 1042434  }
  0x15   :  { %v45_v2 = vshrl.u32 %v44_v0, 7  ;;  %v38_v28 = vld [vmem:[#allocation3 + $0x18] sm:$0xff]  ;;  %v36_v29 = vld [vmem:[#allocation3 + $0x8] sm:$0xff]  ;;  %v39_v41 = vld [vmem:[#allocation3 + $0x20] sm:$0xff]  ;;  %vm178_vm3 = vcmask 1043459   ;;  %vm180_vm4 = vcmask 1044484  }
  0x16   :  { %v40_v40 = vld [vmem:[#allocation3 + $0x28] sm:$0xff]  ;;  %v42_v56 = vld [vmem:[#allocation3 + $0x38] sm:$0xff]  ;;  %v41_v57 = vld [vmem:[#allocation3 + $0x30] sm:$0xff]  ;;  %vm182_vm5 = vcmask 1045509   ;;  %vm184_vm6 = vcmask 1046534   ;;  %vm186_vm7 = vcmask 1047559  }
  0x17   :  { %v60_v3 = vsub.s32 2, %v45_v2  ;;  %v46_v4 = vsub.s32 0, %v45_v2  ;;  %v67_v5 = vsub.s32 3, %v45_v2  ;;  %v53_v6 = vsub.s32 1, %v45_v2  ;;  %s278_s2 = smov [#allocation6]  }
  0x18   :  { %v81_v12 = vsub.s32 5, %v45_v2  ;;  %v74_v13 = vsub.s32 4, %v45_v2  ;;  %v95_v16 = vsub.s32 7, %v45_v2  ;;  %v88_v17 = vsub.s32 6, %v45_v2  ;;  %s209_s28 = sshll.u32 %s278_s2, 4  ;;  %s210_s28 = int_to_ptr.vmem [resolvable:$true] %s209_s28 }
  0x19   :  { %v61_v8 = vrot.slane %v43_v7, %v60_v3  ;;  %v47_v9 = vrot.slane %v43_v7, %v46_v4  ;;  %v68_v10 = vrot.slane %v43_v7, %v67_v5  ;;  %v54_v11 = vrot.slane %v43_v7, %v53_v6  ;;  %s247_s29 = scalar_lea.vmem %s210_s28, 128  ;;  %p252_p9 = scmp.lt.s32.totalorder %s210_s28, %s210_s28 }
  0x1a   :  { %v82_v14 = vrot.slane %v43_v7, %v81_v12  ;;  %v75_v15 = vrot.slane %v43_v7, %v74_v13  ;;  %v96_v18 = vrot.slane %v43_v7, %v95_v16  ;;  %v89_v19 = vrot.slane %v43_v7, %v88_v17  ;;  %p248_p8 = scmp.ne.s32.totalorder %s210_s28, %s247_s29  ;;  %p253_p10 = scmp.lt.s32.totalorder %s247_s29, %s247_s29 }
  0x1b   :  { %63 = vbcast.lane.b32.xlu1 %v61_v8, 256  ;;  %49 = vbcast.lane.b32.xlu0 %v47_v9, 256 }
  0x1c   :  { %p254_p11 = por %p253_p10, %p252_p9 }
  0x1e   :  { %p255_p12 = pnand %p254_p11, %p248_p8 }
  0x1f   :  { %70 = vbcast.lane.b32.xlu1 %v68_v10, 256  ;;  %56 = vbcast.lane.b32.xlu0 %v54_v11, 256 }
  0x23   :  { %84 = vbcast.lane.b32.xlu1 %v82_v14, 256  ;;  %77 = vbcast.lane.b32.xlu0 %v75_v15, 256 }
  0x27   :  { %98 = vbcast.lane.b32.xlu1 %v96_v18, 256  ;;  %91 = vbcast.lane.b32.xlu0 %v89_v19, 256 }
  0x2b   :  { %198 = vperm.xlu0 %224, %v195_v21  }
  0x8d   :  { %v64_v24 = vpop.permute.xlu1 %63  ;;  %v50_v25 = vpop.permute.xlu0 %49 }
  0x8e   :  { %v102_v26 = vmul.f32 %v64_v24, %v37_v22  ;;  %v100_v27 = vmul.f32 %v50_v25, %v35_v23 }
  0x90   :  { %v124_v30 = vsel %vm33_vm0, %v102_v26, 0.0  ;;  %v110_v31 = vsel %vm33_vm0, %v100_v27, 0.0 }
  0x91   :  { %v125_v32 = vrot.slane %v124_v30, 4  ;;  %v111_v33 = vrot.slane %v110_v31, 4  ;;  %v71_v34 = vpop.permute.xlu1 %70  ;;  %v57_v35 = vpop.permute.xlu0 %56 }
  0x92   :  { %v103_v36 = vmul.f32 %v71_v34, %v38_v28  ;;  %v101_v37 = vmul.f32 %v57_v35, %v36_v29 }
  0x93   :  { %v126_v38 = vadd.f32 %v125_v32, %v124_v30  ;;  %v112_v39 = vadd.f32 %v111_v33, %v110_v31 }
  0x94   :  { %v131_v42 = vsel %vm33_vm0, %v103_v36, 0.0  ;;  %v117_v43 = vsel %vm33_vm0, %v101_v37, 0.0 }
  0x95   :  { %v127_v44 = vrot.slane %v126_v38, 2  ;;  %v113_v45 = vrot.slane %v112_v39, 2  ;;  %v132_v46 = vrot.slane %v131_v42, 4  ;;  %v118_v47 = vrot.slane %v117_v43, 4  ;;  %v85_v48 = vpop.permute.xlu1 %84  ;;  %v78_v49 = vpop.permute.xlu0 %77 }
  0x96   :  { %v105_v50 = vmul.f32 %v85_v48, %v40_v40  ;;  %v104_v51 = vmul.f32 %v78_v49, %v39_v41 }
  0x97   :  { %v128_v52 = vadd.f32 %v127_v44, %v126_v38  ;;  %v114_v53 = vadd.f32 %v113_v45, %v112_v39  ;;  %v133_v54 = vadd.f32 %v132_v46, %v131_v42  ;;  %v119_v55 = vadd.f32 %v118_v47, %v117_v43  ;;  %v108_v42 = vld [vmem:[#allocation2] sm:$0xff] }
  0x98   :  { %v145_v58 = vsel %vm33_vm0, %v105_v50, 0.0  ;;  %v138_v59 = vsel %vm33_vm0, %v104_v51, 0.0 }
  0x99   :  { %v134_v60 = vrot.slane %v133_v54, 2  ;;  %v120_v61 = vrot.slane %v119_v55, 2  ;;  %v99_v62 = vpop.permute.xlu1 %98  ;;  %v92_v63 = vpop.permute.xlu0 %91  ;;  %v146_v0 = vrot.slane %v145_v58, 4  ;;  %v139_v1 = vrot.slane %v138_v59, 4 }
  0x9a   :  { %v107_v2 = vmul.f32 %v99_v62, %v42_v56  ;;  %v106_v3 = vmul.f32 %v92_v63, %v41_v57  ;;  %v129_v4 = vrot.slane %v128_v52, 1  ;;  %v115_v5 = vrot.slane %v114_v53, 1 }
  0x9b   :  { %v135_v6 = vadd.f32 %v134_v60, %v133_v54  ;;  %v121_v7 = vadd.f32 %v120_v61, %v119_v55  ;;  %v147_v8 = vadd.f32 %v146_v0, %v145_v58  ;;  %v140_v9 = vadd.f32 %v139_v1, %v138_v59 }
  0x9c   :  { %v159_v10 = vsel %vm33_vm0, %v107_v2, 0.0  ;;  %v152_v11 = vsel %vm33_vm0, %v106_v3, 0.0  ;;  %v116_v18 = vadd.f32 %v115_v5, %v114_v53  ;;  %v130_v22 = vadd.f32 %v129_v4, %v128_v52 }
  0x9d   :  { %v136_v12 = vrot.slane %v135_v6, 1  ;;  %v122_v13 = vrot.slane %v121_v7, 1  ;;  %v160_v14 = vrot.slane %v159_v10, 4  ;;  %v153_v15 = vrot.slane %v152_v11, 4 }
  0x9e   :  { %v148_v16 = vrot.slane %v147_v8, 2  ;;  %v141_v17 = vrot.slane %v140_v9, 2 }
  0x9f   :  { %v123_v19 = vadd.f32 %v122_v13, %v121_v7  ;;  %v161_v20 = vadd.f32 %v160_v14, %v159_v10  ;;  %v154_v21 = vadd.f32 %v153_v15, %v152_v11  ;;  %v137_v25 = vadd.f32 %v136_v12, %v135_v6 }
  0xa0   :  { %v149_v23 = vadd.f32 %v148_v16, %v147_v8  ;;  %v142_v24 = vadd.f32 %v141_v17, %v140_v9 }
  0xa1   :  { %v175_v26 = vsel %vm174_vm1, %v123_v19, %v116_v18  ;;  %v162_v27 = vrot.slane %v161_v20, 2  ;;  %v155_v28 = vrot.slane %v154_v21, 2 }
  0xa2   :  { %v177_v29 = vsel %vm176_vm2, %v130_v22, %v175_v26  ;;  %v150_v30 = vrot.slane %v149_v23, 1  ;;  %v143_v31 = vrot.slane %v142_v24, 1 }
  0xa3   :  { %v179_v32 = vsel %vm178_vm3, %v137_v25, %v177_v29  ;;  %v163_v33 = vadd.f32 %v162_v27, %v161_v20  ;;  %v156_v34 = vadd.f32 %v155_v28, %v154_v21 }
  0xa4   :  { %v151_v35 = vadd.f32 %v150_v30, %v149_v23  ;;  %v144_v36 = vadd.f32 %v143_v31, %v142_v24 }
  0xa5   :  { %v164_v37 = vrot.slane %v163_v33, 1  ;;  %v157_v38 = vrot.slane %v156_v34, 1 }
  0xa6   :  { %v181_v39 = vsel %vm180_vm4, %v144_v36, %v179_v32 }
  0xa7   :  { %v165_v40 = vadd.f32 %v164_v37, %v163_v33  ;;  %v158_v41 = vadd.f32 %v157_v38, %v156_v34  ;;  %v183_v43 = vsel %vm182_vm5, %v151_v35, %v181_v39 }
  0xa9   :  { %v185_v44 = vsel %vm184_vm6, %v158_v41, %v183_v43 }
  0xaa   :  { %v187_v45 = vsel %vm186_vm7, %v165_v40, %v185_v44  ;;  %v199_v47 = vpop.permute.xlu0 %198 }
  0xab   :  { %v189_v46 = vadd.f32 %v187_v45, %v108_v42 }
  0xad   :  { %190 = vst.msk [vmem:[#allocation2] sm:$0xff] %vm33_vm0, %v189_v46 }
  0xb4   :  { %v194_v48 = vld [vmem:[#allocation2] sm:$0xff] }
  0xb5   :  { %v201_v49 = vmul.f32 %v199_v47, %v194_v48 }
  0xb7   :  { %202 = vst.msk [vmem:[#allocation6] sm:$0xff] %vm33_vm0, %v201_v49 }
  0xb8   :  { %258 = shalt.err (!%p255_p12)
}
  0xb9   :  { %s259_s5 = scalar_lea.hbm %s343_s3, 128 }
  0xba   :  { %p260_p13 = scmp.ne.s32.totalorder %s343_s3, %s259_s5  ;;  %p263_p0 = scmp.lt.u32.totalorder %s259_s5, %s343_s3 }
  0xbc   :  { %p265_p1 = pnand %p263_p0, %p260_p13 }
  0xbe   :  { %268 = shalt.err (!%p265_p1)
}
  0xbf   :  { %212 = dma.vmem_to_hbm [thread:$0]  %s210_s28, 128, %s343_s3, [#allocation5]  }
  0xc0   :  { %271 = dma.done.wait [#allocation5], 128  }
  0xc1   :  { %272 = vsyncadd [#allocation5], 4294967168 }
  0xc2   :  { %216 = vsyncpa [#allocation4], 1 }
  0xc3   :  { %217 = vsyncpa [#allocation5], 1 }

</bundles_post_ra>
